<compile_context>
chip_gen: v5e
topology: v5e:2x2
jax: 0.10.0
libtpu: 0.0.40
codegen_flags: <defaults>
</compile_context>

<pallas_src>
import jax
import jax.numpy as jnp
from jax.experimental import pallas as pl
from jax.experimental.pallas import tpu as pltpu

_EPS = 1e-6

# deterministic "cfg" values (cfg.MODEL.EAST.*_WEIGHT) — classic EAST weighting
SCORE_WEIGHT = 1.0
DISTANCE_WEIGHT = 1.0
ROTATION_WEIGHT = 10.0

_LANES = 128
_S_TARGET = 256   # sublane rows per spatial chunk: 256*128 px -> ~1.7 MB/step over 13 ch f32


def _east_partial_sums_kernel(sgr_ref, pd_ref, gd_ref, m_ref, out_ref):
    """One (batch, spatial-chunk) grid step.

    Inputs (VMEM tiles):
      sgr_ref: (1, 4, S, 128) channels = [pred_score, gt_score, pred_rot, gt_rot]
      pd_ref : (1, 4, S, 128) predicted distances d1..d4
      gd_ref : (1, 4, S, 128) ground-truth distances d1..d4
      m_ref  : (1, 1, S, 128) int8 training mask (nearest-resized in wrapper)

    Output (per-step, lane-dense):
      out_ref: (1, 1, 8, 128) per-lane partial sums:
        row 0: sum(pred_score * gt_score * mask)   (dice intersection)
        row 1: sum(pred_score * mask)
        row 2: sum(gt_score   * mask)
        row 3: sum(-log(iou_dist) * gt_score)      (distance IoU loss)
        row 4: sum( iou_dist     * gt_score)       (distance IoU metric)
        row 5: sum((1-cos(dtheta)) * gt_score)     (rotation loss)
        row 6: sum(gt_score)
        row 7: zero padding
    """
    f32 = jnp.float32

    # Upcast in-kernel (no-op for f32 inputs, cheap for bf16); natural (S,128) tiles.
    ps = sgr_ref[0, 0].astype(f32)
    gs = sgr_ref[0, 1].astype(f32)
    pr = sgr_ref[0, 2].astype(f32)
    gr = sgr_ref[0, 3].astype(f32)
    m = (m_ref[0, 0] != 0).astype(f32)

    d1p = pd_ref[0, 0].astype(f32)
    d2p = pd_ref[0, 1].astype(f32)
    d3p = pd_ref[0, 2].astype(f32)
    d4p = pd_ref[0, 3].astype(f32)
    d1g = gd_ref[0, 0].astype(f32)
    d2g = gd_ref[0, 1].astype(f32)
    d3g = gd_ref[0, 2].astype(f32)
    d4g = gd_ref[0, 3].astype(f32)

    # ---- Dice (score) partial terms, masked by the training mask ----
    psm = ps * m
    gsm = gs * m

    # ---- Distance IoU (AABB), weighted by gt score map ----
    area_p = (d1p + d3p) * (d2p + d4p)
    area_g = (d1g + d3g) * (d2g + d4g)
    w_union = jnp.minimum(d2g, d2p) + jnp.minimum(d4g, d4p)
    h_union = jnp.minimum(d1g, d1p) + jnp.minimum(d3g, d3p)
    area_inter = w_union * h_union
    area_union = area_p + area_g - area_inter
    iou = (area_inter + 1.0) / (area_union + 1.0)           # exact (logged metric)
    # -log(iou) as a log difference: both logs go to the otherwise-idle EUP and
    # the extra divide disappears from the VALU path.
    dist_loss = jnp.log(area_union + 1.0) - jnp.log(area_inter + 1.0)

    # ---- Rotation loss, weighted by gt score map ----
    rot_loss = 1.0 - jnp.cos(pr - gr)

    # Sublane-only reductions -> (1, 128) per quantity; the 128-lane reduction
    # happens once in the wrapper on the tiny (B, n_chunks, 8, 128) output.
    out_ref[0, 0, 0:1, :] = jnp.sum(psm * gs, axis=0, keepdims=True)
    out_ref[0, 0, 1:2, :] = jnp.sum(psm, axis=0, keepdims=True)
    out_ref[0, 0, 2:3, :] = jnp.sum(gsm, axis=0, keepdims=True)
    out_ref[0, 0, 3:4, :] = jnp.sum(dist_loss * gs, axis=0, keepdims=True)
    out_ref[0, 0, 4:5, :] = jnp.sum(iou * gs, axis=0, keepdims=True)
    out_ref[0, 0, 5:6, :] = jnp.sum(rot_loss * gs, axis=0, keepdims=True)
    out_ref[0, 0, 6:7, :] = jnp.sum(gs, axis=0, keepdims=True)
    out_ref[0, 0, 7:8, :] = jnp.zeros((1, _LANES), f32)


def _nearest_resize(mask, out_hw):
    """PyTorch F.interpolate(mode='nearest') semantics: src = floor(dst*in/out)."""
    _, _, hm, wm = mask.shape
    h, w = out_hw
    if (hm, wm) == (h, w):
        return mask
    rows = (jnp.arange(h) * hm) // h
    cols = (jnp.arange(w) * wm) // w
    return mask[:, :, rows, :][:, :, :, cols]


def _to_lane_tiles(x, s_pad):
    """(B, C, H, W) -> (B, C, s_pad, 128), zero-padded flattened spatial axis.

    Zero padding is loss-neutral: every accumulated term is weighted by gt_score
    and/or the mask (both 0 on padding), and the padded distance term gives
    log(1) - log(1) = 0.
    """
    b, c, h, w = x.shape
    hw = h * w
    x = x.reshape(b, c, hw)
    pad = s_pad * _LANES - hw
    if pad:
        x = jnp.pad(x, ((0, 0), (0, 0), (0, pad)))
    return x.reshape(b, c, s_pad, _LANES)


def _spatial_tiling(hw):
    """Returns (s_pad, s_chunk, n_chunks) for the flattened spatial axis."""
    s = -(-hw // _LANES)
    if s <= _S_TARGET:
        return s, s, 1                      # single chunk; block == full dim
    n_chunks = -(-s // _S_TARGET)
    return n_chunks * _S_TARGET, _S_TARGET, n_chunks


def east_criterion(predicted, target,
                   score_weight=SCORE_WEIGHT,
                   distance_weight=DISTANCE_WEIGHT,
                   rotation_weight=ROTATION_WEIGHT):
    ps = predicted['east_score_map']        # (B,1,H,W), native dtype (f32 or bf16)
    pd = predicted['east_distance_map']     # (B,4,H,W)
    pr = predicted['east_rotation_map']     # (B,1,H,W)
    gs = target['east_score_map']
    gd = target['east_distance_map']
    gr = target['east_rotation_map']
    tm = target['training_mask']            # (B,1,Hm,Wm)

    B, _, H, W = ps.shape
    HW = H * W

    # training_mask -> nearest resize to score-map resolution, kept as int8
    # (4x fewer mask bytes than a materialized f32 mask).
    tm_i8 = (_nearest_resize(tm, (H, W)) != 0).astype(jnp.int8)

    # Pack the four single-channel maps into one tensor (fewer DMA streams).
    sgr = jnp.concatenate([ps, gs, pr, gr], axis=1)      # (B,4,H,W)

    s_pad, s_chunk, n_chunks = _spatial_tiling(HW)

    sgr_t = _to_lane_tiles(sgr, s_pad)
    pd_t = _to_lane_tiles(pd, s_pad)
    gd_t = _to_lane_tiles(gd, s_pad)
    tm_t = _to_lane_tiles(tm_i8, s_pad)

    spec4 = pl.BlockSpec((1, 4, s_chunk, _LANES), lambda b, c: (b, 0, c, 0))
    spec1 = pl.BlockSpec((1, 1, s_chunk, _LANES), lambda b, c: (b, 0, c, 0))
    out_spec = pl.BlockSpec((1, 1, 8, _LANES), lambda b, c: (b, c, 0, 0))

    partial = pl.pallas_call(
        _east_partial_sums_kernel,
        out_shape=jax.ShapeDtypeStruct((B, n_chunks, 8, _LANES), jnp.float32),
        grid=(B, n_chunks),
        in_specs=[spec4, spec4, spec4, spec1],
        out_specs=out_spec,
        compiler_params=pltpu.CompilerParams(
            dimension_semantics=("parallel", "parallel"),
            vmem_limit_bytes=32 * 1024 * 1024),
    )(sgr_t, pd_t, gd_t, tm_t)

    # Single tiny final reduction (grid steps + 128 lanes) in the wrapper.
    sums = jnp.sum(partial, axis=(0, 1, 3))              # (8,)
    inter, p_sum, g_sum = sums[0], sums[1], sums[2]
    dl_sum, di_sum, rl_sum, gt_sum = sums[3], sums[4], sums[5], sums[6]

    # Dice coefficient loss + score IoU
    dice = 2.0 * inter / (p_sum + g_sum + _EPS)
    score_loss = 1.0 - dice
    score_iou = inter / (p_sum + g_sum - inter + _EPS)

    # Distance IoU loss / metric (averaged over positive gt pixels).
    # TODO(synk): geometry losses are weighted by gt_score only (not additionally
    # by the training mask), matching the original EASTCriterion call signature.
    distance_loss = dl_sum / (gt_sum + _EPS)
    distance_iou = di_sum / (gt_sum + _EPS)

    # Rotation loss (averaged over positive gt pixels)
    rotation_loss = rl_sum / (gt_sum + _EPS)

    east_loss = (score_loss * score_weight
                 + distance_loss * distance_weight
                 + rotation_loss * rotation_weight)

    losses = {
        'east_loss': east_loss,
        'east_score_loss': score_loss,
        'east_distance_loss': distance_loss,
        'east_rotation_loss': rotation_loss,
    }
    metries = {
        'east_pred_score_map': ps,
        'east_pred_distance_map': pd,
        'east_pred_ratation_map': pr,   # key spelling kept from original module
        'east_gt_score_map': gs,
        'east_gt_distance_map': gd,
        'east_gt_rotation_map': gr,
        'east_score_iou': score_iou,
        'east_distance_iou': distance_iou,
    }
    return east_loss, losses, metries


if __name__ == "__main__":
    key = jax.random.PRNGKey(0)
    B, H, W = 2, 16, 16
    Hm, Wm = 32, 32  # training mask at full resolution; nearest-resized down

    k = jax.random.split(key, 8)
    predicted = {
        'east_score_map': jax.nn.sigmoid(jax.random.normal(k[0], (B, 1, H, W))),
        'east_distance_map': jax.nn.softplus(jax.random.normal(k[1], (B, 4, H, W))) * 4.0,
        'east_rotation_map': 0.5 * jax.random.normal(k[2], (B, 1, H, W)),
    }
    target = {
        'east_score_map': (jax.random.uniform(k[3], (B, 1, H, W)) > 0.5).astype(jnp.float32),
        'east_distance_map': jax.nn.softplus(jax.random.normal(k[4], (B, 4, H, W))) * 4.0,
        'east_rotation_map': 0.5 * jax.random.normal(k[5], (B, 1, H, W)),
        'training_mask': (jax.random.uniform(k[6], (B, 1, Hm, Wm)) > 0.2).astype(jnp.float32),
    }

    east_loss, losses, metries = east_criterion(predicted, target)
    jax.block_until_ready(east_loss)
    jax.block_until_ready(losses['east_score_loss'])
    jax.block_until_ready(metries['east_score_iou'])
    # TODO(synk): exact sub-loss definitions (DiceCoefficientLoss / DistanceIouLoss /
    # RotationLoss) are not in the snippet; standard EAST formulations are used.
    print("KERNEL_OK")
</pallas_src>

<mosaic_0001>
module attributes {stable_mosaic.version = 11 : i64} {
  func.func @_east_partial_sums_kernel(%arg0: i32, %arg1: i32, %arg2: memref<1x4x2x128xf32, #tpu.memory_space<vmem>>, %arg3: memref<1x4x2x128xf32, #tpu.memory_space<vmem>>, %arg4: memref<1x4x2x128xf32, #tpu.memory_space<vmem>>, %arg5: memref<1x1x2x128xi8, #tpu.memory_space<vmem>>, %arg6: memref<1x1x8x128xf32, #tpu.memory_space<vmem>>) attributes {dimension_semantics = [#tpu.dimension_semantics<parallel>, #tpu.dimension_semantics<parallel>], iteration_bounds = array<i64: 2, 1>, scalar_prefetch = 0 : i64, scratch_operands = 0 : i64, tpu.core_type = #tpu.core_type<tc>, window_params = [{transform_indices = @transform_0, window_bounds = array<i64: 1, 4, 2, 128>}, {transform_indices = @transform_1, window_bounds = array<i64: 1, 4, 2, 128>}, {transform_indices = @transform_2, window_bounds = array<i64: 1, 4, 2, 128>}, {transform_indices = @transform_3, window_bounds = array<i64: 1, 1, 2, 128>}, {transform_indices = @transform_4, window_bounds = array<i64: 1, 1, 8, 128>}]} {
    %c0 = arith.constant 0 : index
    %c0_0 = arith.constant 0 : index
    %c0_1 = arith.constant 0 : index
    %c0_2 = arith.constant 0 : index
    %0 = vector.load %arg2[%c0, %c0_0, %c0_1, %c0_2] : memref<1x4x2x128xf32, #tpu.memory_space<vmem>>, vector<1x1x2x128xf32>
    %1 = vector.shape_cast %0 : vector<1x1x2x128xf32> to vector<2x128xf32>
    %c0_3 = arith.constant 0 : index
    %c1 = arith.constant 1 : index
    %c0_4 = arith.constant 0 : index
    %c0_5 = arith.constant 0 : index
    %2 = vector.load %arg2[%c0_3, %c1, %c0_4, %c0_5] : memref<1x4x2x128xf32, #tpu.memory_space<vmem>>, vector<1x1x2x128xf32>
    %3 = vector.shape_cast %2 : vector<1x1x2x128xf32> to vector<2x128xf32>
    %c0_6 = arith.constant 0 : index
    %c2 = arith.constant 2 : index
    %c0_7 = arith.constant 0 : index
    %c0_8 = arith.constant 0 : index
    %4 = vector.load %arg2[%c0_6, %c2, %c0_7, %c0_8] : memref<1x4x2x128xf32, #tpu.memory_space<vmem>>, vector<1x1x2x128xf32>
    %5 = vector.shape_cast %4 : vector<1x1x2x128xf32> to vector<2x128xf32>
    %c0_9 = arith.constant 0 : index
    %c3 = arith.constant 3 : index
    %c0_10 = arith.constant 0 : index
    %c0_11 = arith.constant 0 : index
    %6 = vector.load %arg2[%c0_9, %c3, %c0_10, %c0_11] : memref<1x4x2x128xf32, #tpu.memory_space<vmem>>, vector<1x1x2x128xf32>
    %7 = vector.shape_cast %6 : vector<1x1x2x128xf32> to vector<2x128xf32>
    %c0_12 = arith.constant 0 : index
    %c0_13 = arith.constant 0 : index
    %c0_14 = arith.constant 0 : index
    %c0_15 = arith.constant 0 : index
    %8 = vector.load %arg5[%c0_12, %c0_13, %c0_14, %c0_15] : memref<1x1x2x128xi8, #tpu.memory_space<vmem>>, vector<1x1x2x128xi8>
    %9 = vector.shape_cast %8 : vector<1x1x2x128xi8> to vector<2x128xi8>
    %c0_i8 = arith.constant 0 : i8
    %10 = vector.broadcast %c0_i8 : i8 to vector<2x128xi8>
    %11 = arith.cmpi ne, %9, %10 : vector<2x128xi8>
    %12 = arith.extui %11 : vector<2x128xi1> to vector<2x128xi32>
    %13 = arith.sitofp %12 : vector<2x128xi32> to vector<2x128xf32>
    %c0_16 = arith.constant 0 : index
    %c0_17 = arith.constant 0 : index
    %c0_18 = arith.constant 0 : index
    %c0_19 = arith.constant 0 : index
    %14 = vector.load %arg3[%c0_16, %c0_17, %c0_18, %c0_19] : memref<1x4x2x128xf32, #tpu.memory_space<vmem>>, vector<1x1x2x128xf32>
    %15 = vector.shape_cast %14 : vector<1x1x2x128xf32> to vector<2x128xf32>
    %c0_20 = arith.constant 0 : index
    %c1_21 = arith.constant 1 : index
    %c0_22 = arith.constant 0 : index
    %c0_23 = arith.constant 0 : index
    %16 = vector.load %arg3[%c0_20, %c1_21, %c0_22, %c0_23] : memref<1x4x2x128xf32, #tpu.memory_space<vmem>>, vector<1x1x2x128xf32>
    %17 = vector.shape_cast %16 : vector<1x1x2x128xf32> to vector<2x128xf32>
    %c0_24 = arith.constant 0 : index
    %c2_25 = arith.constant 2 : index
    %c0_26 = arith.constant 0 : index
    %c0_27 = arith.constant 0 : index
    %18 = vector.load %arg3[%c0_24, %c2_25, %c0_26, %c0_27] : memref<1x4x2x128xf32, #tpu.memory_space<vmem>>, vector<1x1x2x128xf32>
    %19 = vector.shape_cast %18 : vector<1x1x2x128xf32> to vector<2x128xf32>
    %c0_28 = arith.constant 0 : index
    %c3_29 = arith.constant 3 : index
    %c0_30 = arith.constant 0 : index
    %c0_31 = arith.constant 0 : index
    %20 = vector.load %arg3[%c0_28, %c3_29, %c0_30, %c0_31] : memref<1x4x2x128xf32, #tpu.memory_space<vmem>>, vector<1x1x2x128xf32>
    %21 = vector.shape_cast %20 : vector<1x1x2x128xf32> to vector<2x128xf32>
    %c0_32 = arith.constant 0 : index
    %c0_33 = arith.constant 0 : index
    %c0_34 = arith.constant 0 : index
    %c0_35 = arith.constant 0 : index
    %22 = vector.load %arg4[%c0_32, %c0_33, %c0_34, %c0_35] : memref<1x4x2x128xf32, #tpu.memory_space<vmem>>, vector<1x1x2x128xf32>
    %23 = vector.shape_cast %22 : vector<1x1x2x128xf32> to vector<2x128xf32>
    %c0_36 = arith.constant 0 : index
    %c1_37 = arith.constant 1 : index
    %c0_38 = arith.constant 0 : index
    %c0_39 = arith.constant 0 : index
    %24 = vector.load %arg4[%c0_36, %c1_37, %c0_38, %c0_39] : memref<1x4x2x128xf32, #tpu.memory_space<vmem>>, vector<1x1x2x128xf32>
    %25 = vector.shape_cast %24 : vector<1x1x2x128xf32> to vector<2x128xf32>
    %c0_40 = arith.constant 0 : index
    %c2_41 = arith.constant 2 : index
    %c0_42 = arith.constant 0 : index
    %c0_43 = arith.constant 0 : index
    %26 = vector.load %arg4[%c0_40, %c2_41, %c0_42, %c0_43] : memref<1x4x2x128xf32, #tpu.memory_space<vmem>>, vector<1x1x2x128xf32>
    %27 = vector.shape_cast %26 : vector<1x1x2x128xf32> to vector<2x128xf32>
    %c0_44 = arith.constant 0 : index
    %c3_45 = arith.constant 3 : index
    %c0_46 = arith.constant 0 : index
    %c0_47 = arith.constant 0 : index
    %28 = vector.load %arg4[%c0_44, %c3_45, %c0_46, %c0_47] : memref<1x4x2x128xf32, #tpu.memory_space<vmem>>, vector<1x1x2x128xf32>
    %29 = vector.shape_cast %28 : vector<1x1x2x128xf32> to vector<2x128xf32>
    %30 = arith.mulf %1, %13 : vector<2x128xf32>
    %31 = arith.mulf %3, %13 : vector<2x128xf32>
    %32 = arith.addf %15, %19 : vector<2x128xf32>
    %33 = arith.addf %17, %21 : vector<2x128xf32>
    %34 = arith.mulf %32, %33 : vector<2x128xf32>
    %35 = arith.addf %23, %27 : vector<2x128xf32>
    %36 = arith.addf %25, %29 : vector<2x128xf32>
    %37 = arith.mulf %35, %36 : vector<2x128xf32>
    %38 = arith.minimumf %25, %17 : vector<2x128xf32>
    %39 = arith.minimumf %29, %21 : vector<2x128xf32>
    %40 = arith.addf %38, %39 : vector<2x128xf32>
    %41 = arith.minimumf %23, %15 : vector<2x128xf32>
    %42 = arith.minimumf %27, %19 : vector<2x128xf32>
    %43 = arith.addf %41, %42 : vector<2x128xf32>
    %44 = arith.mulf %40, %43 : vector<2x128xf32>
    %45 = arith.addf %34, %37 : vector<2x128xf32>
    %46 = arith.subf %45, %44 : vector<2x128xf32>
    %cst = arith.constant 1.000000e+00 : f32
    %47 = vector.broadcast %cst : f32 to vector<2x128xf32>
    %48 = arith.addf %44, %47 : vector<2x128xf32>
    %cst_48 = arith.constant 1.000000e+00 : f32
    %49 = vector.broadcast %cst_48 : f32 to vector<2x128xf32>
    %50 = arith.addf %46, %49 : vector<2x128xf32>
    %51 = arith.divf %48, %50 : vector<2x128xf32>
    %cst_49 = arith.constant 1.000000e+00 : f32
    %52 = vector.broadcast %cst_49 : f32 to vector<2x128xf32>
    %53 = arith.addf %46, %52 : vector<2x128xf32>
    %54 = math.log %53 : vector<2x128xf32>
    %cst_50 = arith.constant 1.000000e+00 : f32
    %55 = vector.broadcast %cst_50 : f32 to vector<2x128xf32>
    %56 = arith.addf %44, %55 : vector<2x128xf32>
    %57 = math.log %56 : vector<2x128xf32>
    %58 = arith.subf %54, %57 : vector<2x128xf32>
    %59 = arith.subf %5, %7 : vector<2x128xf32>
    %60 = math.cos %59 : vector<2x128xf32>
    %cst_51 = arith.constant 1.000000e+00 : f32
    %61 = vector.broadcast %cst_51 : f32 to vector<2x128xf32>
    %62 = arith.subf %61, %60 : vector<2x128xf32>
    %63 = arith.mulf %30, %3 : vector<2x128xf32>
    %cst_52 = arith.constant dense<0.000000e+00> : vector<128xf32>
    %64 = vector.multi_reduction <add>, %63, %cst_52 [0] : vector<2x128xf32> to vector<128xf32>
    %65 = vector.shape_cast %64 : vector<128xf32> to vector<1x128xf32>
    %c0_53 = arith.constant 0 : index
    %c0_54 = arith.constant 0 : index
    %c0_55 = arith.constant 0 : index
    %c0_56 = arith.constant 0 : index
    %66 = vector.load %arg6[%c0_53, %c0_54, %c0_55, %c0_56] : memref<1x1x8x128xf32, #tpu.memory_space<vmem>>, vector<1x1x1x128xf32>
    %67 = vector.shape_cast %66 : vector<1x1x1x128xf32> to vector<1x128xf32>
    %68 = vector.shape_cast %65 : vector<1x128xf32> to vector<1x1x1x128xf32>
    tpu.vector_store %arg6[%c0_53, %c0_54, %c0_55, %c0_56], %68 {strides = array<i32>} : memref<1x1x8x128xf32, #tpu.memory_space<vmem>>, vector<1x1x1x128xf32>,
    %cst_57 = arith.constant dense<0.000000e+00> : vector<128xf32>
    %69 = vector.multi_reduction <add>, %30, %cst_57 [0] : vector<2x128xf32> to vector<128xf32>
    %70 = vector.shape_cast %69 : vector<128xf32> to vector<1x128xf32>
    %c0_58 = arith.constant 0 : index
    %c0_59 = arith.constant 0 : index
    %c1_60 = arith.constant 1 : index
    %c0_61 = arith.constant 0 : index
    %71 = vector.load %arg6[%c0_58, %c0_59, %c1_60, %c0_61] : memref<1x1x8x128xf32, #tpu.memory_space<vmem>>, vector<1x1x1x128xf32>
    %72 = vector.shape_cast %71 : vector<1x1x1x128xf32> to vector<1x128xf32>
    %73 = vector.shape_cast %70 : vector<1x128xf32> to vector<1x1x1x128xf32>
    tpu.vector_store %arg6[%c0_58, %c0_59, %c1_60, %c0_61], %73 {strides = array<i32>} : memref<1x1x8x128xf32, #tpu.memory_space<vmem>>, vector<1x1x1x128xf32>,
    %cst_62 = arith.constant dense<0.000000e+00> : vector<128xf32>
    %74 = vector.multi_reduction <add>, %31, %cst_62 [0] : vector<2x128xf32> to vector<128xf32>
    %75 = vector.shape_cast %74 : vector<128xf32> to vector<1x128xf32>
    %c0_63 = arith.constant 0 : index
    %c0_64 = arith.constant 0 : index
    %c2_65 = arith.constant 2 : index
    %c0_66 = arith.constant 0 : index
    %76 = vector.load %arg6[%c0_63, %c0_64, %c2_65, %c0_66] : memref<1x1x8x128xf32, #tpu.memory_space<vmem>>, vector<1x1x1x128xf32>
    %77 = vector.shape_cast %76 : vector<1x1x1x128xf32> to vector<1x128xf32>
    %78 = vector.shape_cast %75 : vector<1x128xf32> to vector<1x1x1x128xf32>
    tpu.vector_store %arg6[%c0_63, %c0_64, %c2_65, %c0_66], %78 {strides = array<i32>} : memref<1x1x8x128xf32, #tpu.memory_space<vmem>>, vector<1x1x1x128xf32>,
    %79 = arith.mulf %58, %3 : vector<2x128xf32>
    %cst_67 = arith.constant dense<0.000000e+00> : vector<128xf32>
    %80 = vector.multi_reduction <add>, %79, %cst_67 [0] : vector<2x128xf32> to vector<128xf32>
    %81 = vector.shape_cast %80 : vector<128xf32> to vector<1x128xf32>
    %c0_68 = arith.constant 0 : index
    %c0_69 = arith.constant 0 : index
    %c3_70 = arith.constant 3 : index
    %c0_71 = arith.constant 0 : index
    %82 = vector.load %arg6[%c0_68, %c0_69, %c3_70, %c0_71] : memref<1x1x8x128xf32, #tpu.memory_space<vmem>>, vector<1x1x1x128xf32>
    %83 = vector.shape_cast %82 : vector<1x1x1x128xf32> to vector<1x128xf32>
    %84 = vector.shape_cast %81 : vector<1x128xf32> to vector<1x1x1x128xf32>
    tpu.vector_store %arg6[%c0_68, %c0_69, %c3_70, %c0_71], %84 {strides = array<i32>} : memref<1x1x8x128xf32, #tpu.memory_space<vmem>>, vector<1x1x1x128xf32>,
    %85 = arith.mulf %51, %3 : vector<2x128xf32>
    %cst_72 = arith.constant dense<0.000000e+00> : vector<128xf32>
    %86 = vector.multi_reduction <add>, %85, %cst_72 [0] : vector<2x128xf32> to vector<128xf32>
    %87 = vector.shape_cast %86 : vector<128xf32> to vector<1x128xf32>
    %c0_73 = arith.constant 0 : index
    %c0_74 = arith.constant 0 : index
    %c4 = arith.constant 4 : index
    %c0_75 = arith.constant 0 : index
    %88 = vector.load %arg6[%c0_73, %c0_74, %c4, %c0_75] : memref<1x1x8x128xf32, #tpu.memory_space<vmem>>, vector<1x1x1x128xf32>
    %89 = vector.shape_cast %88 : vector<1x1x1x128xf32> to vector<1x128xf32>
    %90 = vector.shape_cast %87 : vector<1x128xf32> to vector<1x1x1x128xf32>
    tpu.vector_store %arg6[%c0_73, %c0_74, %c4, %c0_75], %90 {strides = array<i32>} : memref<1x1x8x128xf32, #tpu.memory_space<vmem>>, vector<1x1x1x128xf32>,
    %91 = arith.mulf %62, %3 : vector<2x128xf32>
    %cst_76 = arith.constant dense<0.000000e+00> : vector<128xf32>
    %92 = vector.multi_reduction <add>, %91, %cst_76 [0] : vector<2x128xf32> to vector<128xf32>
    %93 = vector.shape_cast %92 : vector<128xf32> to vector<1x128xf32>
    %c0_77 = arith.constant 0 : index
    %c0_78 = arith.constant 0 : index
    %c5 = arith.constant 5 : index
    %c0_79 = arith.constant 0 : index
    %94 = vector.load %arg6[%c0_77, %c0_78, %c5, %c0_79] : memref<1x1x8x128xf32, #tpu.memory_space<vmem>>, vector<1x1x1x128xf32>
    %95 = vector.shape_cast %94 : vector<1x1x1x128xf32> to vector<1x128xf32>
    %96 = vector.shape_cast %93 : vector<1x128xf32> to vector<1x1x1x128xf32>
    tpu.vector_store %arg6[%c0_77, %c0_78, %c5, %c0_79], %96 {strides = array<i32>} : memref<1x1x8x128xf32, #tpu.memory_space<vmem>>, vector<1x1x1x128xf32>,
    %cst_80 = arith.constant dense<0.000000e+00> : vector<128xf32>
    %97 = vector.multi_reduction <add>, %3, %cst_80 [0] : vector<2x128xf32> to vector<128xf32>
    %98 = vector.shape_cast %97 : vector<128xf32> to vector<1x128xf32>
    %c0_81 = arith.constant 0 : index
    %c0_82 = arith.constant 0 : index
    %c6 = arith.constant 6 : index
    %c0_83 = arith.constant 0 : index
    %99 = vector.load %arg6[%c0_81, %c0_82, %c6, %c0_83] : memref<1x1x8x128xf32, #tpu.memory_space<vmem>>, vector<1x1x1x128xf32>
    %100 = vector.shape_cast %99 : vector<1x1x1x128xf32> to vector<1x128xf32>
    %101 = vector.shape_cast %98 : vector<1x128xf32> to vector<1x1x1x128xf32>
    tpu.vector_store %arg6[%c0_81, %c0_82, %c6, %c0_83], %101 {strides = array<i32>} : memref<1x1x8x128xf32, #tpu.memory_space<vmem>>, vector<1x1x1x128xf32>,
    %cst_84 = arith.constant 0.000000e+00 : f32
    %102 = vector.broadcast %cst_84 : f32 to vector<1x128xf32>
    %c0_85 = arith.constant 0 : index
    %c0_86 = arith.constant 0 : index
    %c7 = arith.constant 7 : index
    %c0_87 = arith.constant 0 : index
    %103 = vector.load %arg6[%c0_85, %c0_86, %c7, %c0_87] : memref<1x1x8x128xf32, #tpu.memory_space<vmem>>, vector<1x1x1x128xf32>
    %104 = vector.shape_cast %103 : vector<1x1x1x128xf32> to vector<1x128xf32>
    %105 = vector.shape_cast %102 : vector<1x128xf32> to vector<1x1x1x128xf32>
    tpu.vector_store %arg6[%c0_85, %c0_86, %c7, %c0_87], %105 {strides = array<i32>} : memref<1x1x8x128xf32, #tpu.memory_space<vmem>>, vector<1x1x1x128xf32>,
    return
  }
  func.func @transform_0(%arg0: i32, %arg1: i32) -> (i32, i32, i32, i32) {
    %c0_i32 = arith.constant 0 : i32
    %c0_i32_0 = arith.constant 0 : i32
    %c0_i32_1 = arith.constant 0 : i32
    return %arg0, %c0_i32, %arg1, %c0_i32_0 : i32, i32, i32, i32
  }
  func.func @transform_1(%arg0: i32, %arg1: i32) -> (i32, i32, i32, i32) {
    %c0_i32 = arith.constant 0 : i32
    %c0_i32_0 = arith.constant 0 : i32
    %c0_i32_1 = arith.constant 0 : i32
    return %arg0, %c0_i32, %arg1, %c0_i32_0 : i32, i32, i32, i32
  }
  func.func @transform_2(%arg0: i32, %arg1: i32) -> (i32, i32, i32, i32) {
    %c0_i32 = arith.constant 0 : i32
    %c0_i32_0 = arith.constant 0 : i32
    %c0_i32_1 = arith.constant 0 : i32
    return %arg0, %c0_i32, %arg1, %c0_i32_0 : i32, i32, i32, i32
  }
  func.func @transform_3(%arg0: i32, %arg1: i32) -> (i32, i32, i32, i32) {
    %c0_i32 = arith.constant 0 : i32
    %c0_i32_0 = arith.constant 0 : i32
    %c0_i32_1 = arith.constant 0 : i32
    return %arg0, %c0_i32, %arg1, %c0_i32_0 : i32, i32, i32, i32
  }
  func.func @transform_4(%arg0: i32, %arg1: i32) -> (i32, i32, i32, i32) {
    %c0_i32 = arith.constant 0 : i32
    %c0_i32_0 = arith.constant 0 : i32
    %c0_i32_1 = arith.constant 0 : i32
    return %arg0, %arg1, %c0_i32, %c0_i32_0 : i32, i32, i32, i32
  }
}

</mosaic_0001>

<bundles_post_ra>
// kernel: tpu_custom_call.1
= control target key start
LH: loop header
LB: loop body
LE: loop exit
PB: predicated region body
PF: predicated region fallthrough
CT: control target
= control target key end

     0   :  { %s1406_s0 = inlined_call_operand.hbm [shape: f32[2,4,2,128], index: 0, kind: input, shape index: {}]   ;;  %s1407_s1 = inlined_call_operand.hbm [shape: f32[2,4,2,128], index: 1, kind: input, shape index: {}]   ;;  %s1408_s2 = inlined_call_operand.hbm [shape: f32[2,4,2,128], index: 2, kind: input, shape index: {}]   ;;  %s1409_s3 = inlined_call_operand.vmem [shape: s8[2,1,2,128], index: 3, kind: input, shape index: {}]   ;;  %s1410_s4 = inlined_call_operand.hbm [shape: f32[2,1,8,128], index: 4, kind: output, shape index: {}]  }
   0x1   :  { %1417 = sst [smem:[#allocation18_spill]] %s1407_s1 }
   0x2   :  { %9 = vsyncpa [#allocation3], 0 }
   0x3   :  { %11 = vsyncpa [#allocation3 + $0x1], 0 }
   0x4   :  { %12 = vsyncpa [#allocation6], 0 }
   0x5   :  { %14 = vsyncpa [#allocation6 + $0x1], 0 }
   0x6   :  { %15 = vsyncpa [#allocation4], 0 }
   0x7   :  { %17 = vsyncpa [#allocation4 + $0x1], 0  ;;  %s1130_s15 = smov 0   ;;  %s1132_s16 = smov 0  }
   0x8   :  { %s1134_s17 = smov 0   ;;  %s1136_s18 = smov 0  }
   0x9   :  { %s1138_s19 = smov 0   ;;  %s1140_s20 = smov 0  }
   0xa LB: > { %1418 = sst [smem:[#allocation12_spill]] %s1081_s17  ;;  %s1161_s21 = sadd.s32 4294967295, %s1093_s20   ;;  %s1093_s20 = sphi %s1140_s20, %s23_s20   ;;  %s1089_s19 = sphi %s1138_s19, %s1442_s19   ;;  %s1085_s18 = sphi %s1136_s18, %s1441_s18   ;;  %s1081_s17 = sphi %s1134_s17, %s1440_s17   ;;  %s1077_s16 = sphi %s1132_s16, %s1444_s16   ;;  %s1073_s15 = sphi %s1130_s15, %s1443_s15  }
   0xb   : > { %1419 = sst [smem:[#allocation13_spill]] %s1089_s19  ;;  %s792_s22 = sadd.s32 4294967294, %s1093_s20  }
   0xc   : > { %1420 = sst [smem:[#allocation14_spill]] %s1093_s20  ;;  %s35_s23 = sadd.s32 1, %s1089_s19 }
   0xd   : > { %s44_s24 = sadd.s32 1, %s1081_s17  ;;  %p37_p0 = scmp.ge.s32.totalorder %s35_s23, 2 }
   0xe   : > { %p51_p1 = scmp.ne.s32.totalorder %s1081_s17, %s1077_s16  ;;  %p52_p2 = scmp.eq.s32.totalorder %s1093_s20, 0 }
   0xf   : > { %p57_p3 = scmp.ne.s32.totalorder %s1077_s16, %s1073_s15  ;;  %s1446_s23 = smov (%p37_p0, %s35_s23), 0 }
  0x10   : > { %1421 = sst [smem:[#allocation15_spill]] %s1446_s23  ;;  %p1173_p4 = por %p52_p2, %p51_p1 }
  0x11   : > { %p58_p5 = scmp.eq.s32.totalorder %s1161_s21, 0  ;;  %s39_s26 = ssub.s32 %s1089_s19, %s1446_s23 }
  0x12   : > { %p167_p6 = scmp.eq.s32.totalorder %s1161_s21, 1  ;;  %p42_p7 = scmp.eq.s32.totalorder %s39_s26, 0 }
  0x13   : > { %p1181_p8 = por %p58_p5, %p57_p3  ;;  %p173_p10 = scmp.eq.s32.totalorder %s792_s22, 1 }
  0x14   : > { %p1185_p9 = por %p167_p6, %p51_p1  ;;  %p794_p12 = scmp.ge.s32.totalorder %s1093_s20, 2 }
  0x15   : > { %s1190_s29 = scalar_select %p42_p7, %s1081_s17, %s44_s24  }
  0x16   : > { %p1192_p11 = por %p173_p10, %p57_p3  ;;  %p851_p13 = scmp.lt.s32.totalorder %s1093_s20, 2 }
  0x17   : > { %1425 = sst [smem:[#allocation16_spill]] %s1190_s29  ;;  %s193_s5 = sand.u32 1, %s1081_s17  }
  0x18   : > { %s1426_s30 = scalar_select %p1192_p11, 1, 0 }
  0x19   : > { %s1199_s6 = sshll.u32 %s193_s5, 3  ;;  %s826_s7 = sshll.u32 %s1089_s19, 3 }
  0x1a   : > { %1427 = sst [smem:[#allocation17_spill]] %s1426_s30  ;;  %p1204_p0 = pnand %p851_p13, %p1173_p4 }
  0x1b   : > { %s216_s9 = sand.u32 1, %s1093_s20   ;;  %s1429_s1 = sld [smem:[#allocation18_spill]] }
  0x1c   : > { %s220_s14 = scalar_lea.vmem [#allocation5], %s1199_s6  ;;  %s217_s24 = scalar_lea.sflag [#allocation6], %s216_s9 }
  0x1d   : > { %s229_s22 = sshll.u32 %s220_s14, 4  ;;  %s1095_s26 = smov 32   ;;  %s230_s22 = int_to_ptr.vmem [resolvable:$true] %s229_s22 }
  0x1e   : > { %s1096_s25 = smov 2   ;;  %p804_p1 = scmp.ge.s32.totalorder %s1093_s20, 1 }
  0x1f   : > { %p269_p2 = scmp.lt.s32.totalorder %s1093_s20, 3  ;;  %s194_s9 = scalar_lea.sflag [#allocation3], %s193_s5 }
  0x20   : > { %s249_s29 = scalar_lea.hbm %s1408_s2, %s826_s7  ;;  %s243_s20 = scalar_lea.vmem [#allocation7], %s1199_s6 }
  0x21   : > { %s226_s12 = scalar_lea.hbm %s1429_s1, %s826_s7  ;;  %p1217_p3 = pnand %p804_p1, %p269_p2 }
  0x22   : > { %s227_s13 = sshll.u32 %s226_s12, 4  ;;  %s203_s12 = scalar_lea.hbm %s1406_s0, %s826_s7  ;;  %s228_s13 = int_to_ptr.hbm [resolvable:$true] %s227_s13 }
  0x23   : > { %843 = dma.hbm_to_vmem [thread:$0]  (!%p1204_p0), %s228_s13, 128, %s230_s22, %s217_s24, %s1095_s26, %s1095_s26, %s1096_s25  }
  0x24   : > { %s204_s14 = sshll.u32 %s203_s12, 4  ;;  %s197_s1 = scalar_lea.vmem [#allocation2], %s1199_s6  ;;  %s205_s14 = int_to_ptr.hbm [resolvable:$true] %s204_s14 }
  0x25   : > { %s206_s19 = sshll.u32 %s197_s1, 4  ;;  %s250_s17 = sshll.u32 %s249_s29, 4  ;;  %s207_s19 = int_to_ptr.vmem [resolvable:$true] %s206_s19  ;;  %s251_s17 = int_to_ptr.hbm [resolvable:$true] %s250_s17 }
  0x26   : > { %840 = dma.hbm_to_vmem [thread:$0]  (!%p1204_p0), %s205_s14, 128, %s207_s19, %s194_s9, %s1095_s26, %s1095_s26, %s1096_s25  }
  0x27   : > { %s252_s30 = sshll.u32 %s243_s20, 4  ;;  %273 = sbr.rel (%p1217_p3) target bundleno = 180 (0xb4), region = 36  ;;  %s253_s30 = int_to_ptr.vmem [resolvable:$true] %s252_s30 }
  0x28   : > { %846 = dma.hbm_to_vmem [thread:$0]  (!%p1204_p0), %s251_s17, 128, %s253_s30, %s217_s24, %s1095_s26, %s1095_s26, %s1096_s25  }
  0x29   : > { %s1236_s1 = sand.u32 (!%p1217_p3), 1, %s1077_s16  }
  0x2a   : > { %s805_s19 = sshll.u32 (!%p1217_p3), %s1236_s1, 3  ;;  %s276_s5 = scalar_lea.sflag (!%p1217_p3), [#allocation3], %s1236_s1 }
  0x2b   : > { %s1240_s10 = scalar_lea.vmem (!%p1217_p3), [#allocation2], %s805_s19 }
  0x2c   : > { %1060 = dma.done.wait (%p1181_p8), %s276_s5, 128  }
  0x2d   : > { %1062 = vsyncadd (%p1181_p8), %s276_s5, 4294967168  ;;  %s285_s17 = sand.u32 1, %s1161_s21   ;;  %s289_s23 = scalar_lea.vmem [#allocation5], %s805_s19 }
  0x2e   : > { %s286_s20 = scalar_lea.sflag [#allocation6], %s285_s17 }
  0x2f   : > { %1064 = dma.done.wait (%p1181_p8), %s286_s20, 256  }
  0x30   : > { %1066 = vsyncadd (%p1181_p8), %s286_s20, 4294967040  ;;  %p341_p4 = scmp.lt.s32.totalorder %s1085_s18, 1  ;;  %s1252_s29 = scalar_lea.vmem [#allocation8], %s805_s19  ;;  %v1097_v0 = vmov 0.0   ;;  %v363_v2 = vld [vmem:[%s289_s23] sm:$0x3] }
  0x31   : > { %633 = vst [vmem:[%s1252_s29 + $0x7] sm:$0x1] %v1097_v0  ;;  %v813_v3 = vld [vmem:[%s289_s23 + $0x2] sm:$0x3]  ;;  %v814_v4 = vld [vmem:[%s289_s23 + $0x4] sm:$0x3] }
  0x32   : > { %s342_s30 = scalar_select %p341_p4, %s1085_s18, 1  ;;  %v349_v5 = vld [vmem:[%s1240_s10] sm:$0x3]  ;;  %v1098_v6 = vmov 0   ;;  %v815_v8 = vld [vmem:[%s289_s23 + $0x6] sm:$0x3]  ;;  %v379_v10 = vadd.f32 %v814_v4, %v363_v2 }
  0x33   : > { %s299_s27 = scalar_lea.vmem [#allocation7], %s805_s19  ;;  %v380_v15 = vadd.f32 %v815_v8, %v813_v3  ;;  %v1262_v17 = vld [vmem:[%s1240_s10 + $0x2] sm:$0x3]  ;;  %v810_v22 = vld [vmem:[%s1240_s10 + $0x4] sm:$0x3]  ;;  %vm573_vm2 = vcmask 1041408  }
  0x34   : > { %s346_s21 = scalar_lea.vmem %s1409_s3, %s342_s30  ;;  %v370_v9 = vld [vmem:[%s299_s27] sm:$0x3]  ;;  %v816_v12 = vld [vmem:[%s299_s27 + $0x2] sm:$0x3]  ;;  %v817_v13 = vld [vmem:[%s299_s27 + $0x4] sm:$0x3] }
  0x35   : > { %v356_v1 = vld [vmem:[%s346_s21] sm:$0x1]  ;;  %v818_v14 = vld [vmem:[%s299_s27 + $0x6] sm:$0x3]  ;;  %v388_v16 = vmin.f32 %v370_v9, %v363_v2  ;;  %v382_v18 = vadd.f32 %v817_v13, %v370_v9  ;;  %v385_v20 = vmin.f32 %v816_v12, %v813_v3  ;;  %v381_v24 = vmul.f32 %v380_v15, %v379_v10  ;;  %s823_s8 = sshll.u32 %s1085_s18, 3  ;;  %s648_s11 = sshll.u32 %s1252_s29, 4  ;;  %s649_s11 = int_to_ptr.vmem [resolvable:$true] %s648_s11 }
  0x36   : > { %vm357_vm0 = vnez %v356_v1  ;;  %v383_v19 = vadd.f32 %v818_v14, %v816_v12  ;;  %v386_v21 = vmin.f32 %v818_v14, %v815_v8  ;;  %v811_v23 = vld [vmem:[%s1240_s10 + $0x6] sm:$0x3]  ;;  %v389_v25 = vmin.f32 %v817_v13, %v814_v4  ;;  %s646_s25 = scalar_lea.hbm %s1410_s4, %s823_s8  ;;  %s635_s14 = scalar_lea.sflag [#allocation4], %s1236_s1 }
  0x37   : > { %v358_v7 = vsel %vm357_vm0, 16843009, %v1098_v6  ;;  %v1266_v26 = vsub.f32 %v810_v22, %v811_v23  ;;  %s650_s12 = sshll.u32 %s646_s25, 4  ;;  %s1027_s19 = scalar_lea.hbm %s1410_s4, 16  ;;  %s651_s12 = int_to_ptr.hbm [resolvable:$true] %s650_s12 }
  0x38   : > { %v359_v11 = vunpack.c.0.s8 %v358_v7  ;;  %v384_v28 = vmul.f32 %v383_v19, %v382_v18  ;;  %v387_v29 = vadd.f32 %v386_v21, %v385_v20  ;;  %v390_v32 = vadd.f32 %v389_v25, %v388_v16  ;;  %s1021_s9 = sshra.s32 %s651_s12, 4  ;;  %s1022_s9 = int_to_ptr.hbm [resolvable:$true] %s1021_s9 }
  0x39   : > { %v420_v34 = vand.u32 2139095040, %v1266_v26  ;;  %v417_v45 = vand.u32 2147483647, %v1266_v26  ;;  %v1099_v19 = vmov 683565275   ;;  %s1023_s13 = scalar_lea.hbm %s1022_s9, 8  ;;  %p1028_p8 = scmp.lt.s32.totalorder %s1022_s9, %s1410_s4 }
  0x3a   : > { %vm360_vm1 = vcmp.ne.s32.totalorder %v359_v11, 0  ;;  %v392_v33 = vadd.f32 %v384_v28, %v381_v24  ;;  %v391_v38 = vmul.f32 %v390_v32, %v387_v29  ;;  %v1100_v21 = vmov 2475754826   ;;  %p1024_p5 = scmp.ne.s32.totalorder %s1022_s9, %s1023_s13  ;;  %p1029_p10 = scmp.lt.s32.totalorder %s1027_s19, %s1023_s13 }
  0x3b   : > { %v812_v27 = vsel %vm360_vm1, 1.0, %v1097_v0  ;;  %v421_v41 = vshrl.u32 %v420_v34, 23  ;;  %v424_v55 = vand.u32 8388607, %v417_v45  ;;  %v1101_v24 = vmov 2131351028  }
  0x3c   : > { %v377_v30 = vmul.f32 %v812_v27, %v349_v5  ;;  %v378_v31 = vmul.f32 %v812_v27, %v1262_v17  ;;  %v393_v43 = vsub.f32 %v392_v33, %v391_v38  ;;  %v1274_v44 = vadd.f32 1.0, %v391_v38  ;;  %p1025_p6 = pnand %p1024_p5, %p1185_p9  ;;  %p1030_p13 = por %p1029_p10, %p1028_p8 }
  0x3d   : > { %v819_v49 = vadd.s32 4294967169, %v421_v41  ;;  %v425_v5 = vor.u32 8388608, %v424_v55  ;;  %v1102_v27 = vmov 2102212464   ;;  %v1103_v32 = vmov 920167782  }
  0x3e   : > { %v572_v35 = vmul.f32 %v1262_v17, %v377_v30  ;;  %v582_v36 = vsel %vm573_vm2, %v377_v30, 0.0  ;;  %v590_v37 = vsel %vm573_vm2, %v378_v31, 0.0  ;;  %v395_v50 = vadd.f32 1.0, %v393_v43  ;;  %p1026_p7 = pneg %p1025_p6 }
  0x3f   : > { %v583_v39 = vrot.slane %v582_v36, 4  ;;  %v591_v40 = vrot.slane %v590_v37, 4  ;;  %911 = vlog2.f32 %v1274_v44  ;;  %v427_v54 = vadd.s32 1, %v819_v49 }
  0x40   : > { %v574_v42 = vsel %vm573_vm2, %v572_v35, 0.0  ;;  %913 = vrcp.f32 %v395_v50  ;;  %v405_v59 = vand.u32 2147483647, %v395_v50  ;;  %v407_v60 = vand.u32 2147483648, %v395_v50  ;;  %p1031_p0 = pnand %p1030_p13, %p1026_p7 }
  0x41   : > { %v575_v46 = vrot.slane %v574_v42, 4  ;;  %v584_v47 = vadd.f32 %v583_v39, %v582_v36  ;;  %v592_v48 = vadd.f32 %v591_v40, %v590_v37  ;;  %915 = vlog2.f32 %v395_v50 }
  0x42   : > { %vm428_vm3 = vcmp.gt.s32.totalorder %v427_v54, 0  ;;  %vm401_vm4 = vweird.f32 %v395_v50  ;;  %vm1280_vm5 = vcmp.eq.f32.partialorder %v405_v59, 8.507059e+37  ;;  %v408_v14 = vor.u32 1.1754944e-38, %v407_v60 }
  0x43   : > { %v576_v51 = vadd.f32 %v575_v46, %v574_v42  ;;  %v585_v52 = vrot.slane %v584_v47, 2  ;;  %v593_v53 = vrot.slane %v592_v48, 2  ;;  %v429_v1 = vsel %vm428_vm3, %v427_v54, 0 }
  0x44   : > { %v431_v10 = vand.u32 31, %v429_v1  ;;  %v1285_v15 = vshrl.u32 %v429_v1, 5  ;;  %v1104_v37 = vmov 1326507024   ;;  %v1298_v43 = vshll.u32 %v425_v5, 8 }
  0x45   : > { %v577_v56 = vrot.slane %v576_v51, 2  ;;  %v586_v57 = vadd.f32 %v585_v52, %v584_v47  ;;  %v594_v58 = vadd.f32 %v593_v53, %v592_v48  ;;  %v912_v0 = vpop.eup %911 }
  0x46   : > { %v914_v7 = vpop.eup %913  ;;  %v414_v8 = vmul.f32 0.6931472, %v912_v0  ;;  %v432_v18 = vsub.s32 32, %v431_v10  ;;  %v434_v20 = vshll.u32 %v1099_v19, %v431_v10  ;;  %v437_v22 = vshll.u32 %v1100_v21, %v431_v10 }
  0x47   : > { %v578_v61 = vadd.f32 %v577_v56, %v576_v51  ;;  %v587_v62 = vrot.slane %v586_v57, 1  ;;  %v595_v63 = vrot.slane %v594_v58, 1  ;;  %v916_v11 = vpop.eup %915  ;;  %v397_v13 = vmul.f32 %v914_v7, %v395_v50 }
  0x48   : > { %v412_v16 = vmul.f32 0.6931472, %v916_v11  ;;  %vm402_vm6 = vweird.f32 %v914_v7  ;;  %v440_v25 = vshll.u32 %v1101_v24, %v431_v10  ;;  %v443_v28 = vshll.u32 %v1102_v27, %v431_v10 }
  0x49   : > { %v579_v2 = vrot.slane %v578_v61, 1  ;;  %v588_v3 = vadd.f32 %v587_v62, %v586_v57  ;;  %v596_v4 = vadd.f32 %v595_v63, %v594_v58  ;;  %v398_v23 = vsub.f32 1.0, %v397_v13  ;;  %vm1292_vm7 = vmor %vm401_vm4, %vm402_vm6 }
  0x4a   : > { %v415_v29 = vsub.f32 %v412_v16, %v414_v8  ;;  %v435_v30 = vshrl.u32 %v1100_v21, %v432_v18  ;;  %v438_v31 = vshrl.u32 %v1101_v24, %v432_v18  ;;  %v446_v33 = vshll.u32 %v1103_v32, %v431_v10 }
  0x4b   : > { %v580_v12 = vadd.f32 %v579_v2, %v578_v61  ;;  %589 = vst [vmem:[%s1252_s29 + $0x1] sm:$0x1] %v588_v3  ;;  %v399_v34 = vmul.f32 %v914_v7, %v398_v23  ;;  %v441_v35 = vshrl.u32 %v1102_v27, %v432_v18  ;;  %v444_v36 = vshrl.u32 %v1103_v32, %v432_v18 }
  0x4c   : > { %597 = vst [vmem:[%s1252_s29 + $0x2] sm:$0x1] %v596_v4  ;;  %v447_v38 = vshrl.u32 %v1104_v37, %v432_v18  ;;  %v598_v39 = vmul.f32 %v1262_v17, %v415_v29  ;;  %v436_v41 = vor.u32 %v435_v30, %v434_v20  ;;  %v1296_v42 = vor.u32 %v438_v31, %v437_v22 }
  0x4d   : > { %581 = vst [vmem:[%s1252_s29] sm:$0x1] %v580_v12  ;;  %v400_v46 = vadd.f32 %v914_v7, %v399_v34  ;;  %v442_v47 = vor.u32 %v441_v35, %v440_v25  ;;  %v445_v48 = vor.u32 %v444_v36, %v443_v28  ;;  %vm449_vm8 = vcmp.lt.s32.totalorder %v1285_v15, 1 }
  0x4e   : > { %v599_v49 = vsel %vm573_vm2, %v598_v39, 0.0  ;;  %v448_v51 = vor.u32 %v447_v38, %v446_v33  ;;  %vm451_vm9 = vcmp.lt.s32.totalorder %v1285_v15, 3  ;;  %vm452_vm10 = vcmp.lt.s32.totalorder %v1285_v15, 4 }
  0x4f   : > { %v600_v50 = vrot.slane %v599_v49, 4  ;;  %v404_v52 = vsel %vm1292_vm7, %v914_v7, %v400_v46  ;;  %vm450_vm11 = vcmp.lt.s32.totalorder %v1285_v15, 2  ;;  %v457_v54 = vsel %vm449_vm8, %v436_v41, %v1296_v42 }
  0x50   : > { %v409_v53 = vsel %vm1280_vm5, %v408_v14, %v404_v52  ;;  %v458_v55 = vsel %vm452_vm10, %v445_v48, 920167782  ;;  %v466_v59 = vand.u32 65535, %v1298_v43  ;;  %v461_v61 = vsel %vm449_vm8, %v1296_v42, %v442_v47 }
  0x51   : > { %v601_v56 = vadd.f32 %v600_v50, %v599_v49  ;;  %v410_v57 = vmul.f32 %v409_v53, %v1274_v44  ;;  %v459_v58 = vsel %vm451_vm9, %v442_v47, %v458_v55  ;;  %v462_v62 = vsel %vm452_vm10, %v448_v51, 1326507024 }
  0x52   : > { %v460_v60 = vsel %vm450_vm11, %v457_v54, %v459_v58  ;;  %v467_v63 = vshrl.u32 %v1298_v43, 16  ;;  %v463_v1 = vsel %vm451_vm9, %v445_v48, %v462_v62  ;;  %v433_v3 = vshrl.u32 %v1099_v19, %v432_v18 }
  0x53   : > { %v602_v0 = vrot.slane %v601_v56, 2  ;;  %v607_v44 = vmul.f32 %v1262_v17, %v410_v57  ;;  %v490_v2 = vand.u32 65535, %v460_v60  ;;  %v464_v4 = vsel %vm450_vm11, %v461_v61, %v463_v1 }
  0x54   : > { %v491_v5 = vshrl.u32 %v460_v60, 16  ;;  %v468_v9 = vand.u32 65535, %v464_v4  ;;  %v469_v10 = vshrl.u32 %v464_v4, 16  ;;  %v453_v30 = vsel %vm449_vm8, %v433_v3, %v436_v41 }
  0x55   : > { %v603_v7 = vadd.f32 %v602_v0, %v601_v56  ;;  %v608_v8 = vsel %vm573_vm2, %v607_v44, 0.0  ;;  %v492_v12 = vmul.u32 %v490_v2, %v466_v59  ;;  %v494_v14 = vmul.u32 %v490_v2, %v467_v63 }
  0x56   : > { %v609_v11 = vrot.slane %v608_v8, 4  ;;  %v493_v13 = vmul.u32 %v491_v5, %v466_v59  ;;  %v470_v20 = vmul.u32 %v468_v9, %v466_v59  ;;  %v471_v21 = vmul.u32 %v469_v10, %v466_v59 }
  0x57   : > { %v604_v16 = vrot.slane %v603_v7, 1  ;;  %v472_v22 = vmul.u32 %v468_v9, %v467_v63  ;;  %v473_v18 = vmul.u32 %v469_v10, %v467_v63  ;;  %v495_v28 = vmul.u32 %v491_v5, %v467_v63 }
  0x58   : > { %v610_v23 = vadd.f32 %v609_v11, %v608_v8  ;;  %v496_v19 = vshll.u32 %v493_v13, 16  ;;  %v474_v25 = vshll.u32 %v471_v21, 16  ;;  %v498_v31 = vshll.u32 %v494_v14, 16 }
  0x59   : > { %v605_v24 = vadd.f32 %v604_v16, %v603_v7  ;;  %v476_v27 = vshll.u32 %v472_v22, 16  ;;  %v454_v32 = vsel %vm452_vm10, %v442_v47, 2102212464  ;;  %v475_v38 = vshrl.u32 %v471_v21, 16 }
  0x5a   : > { %v611_v29 = vrot.slane %v610_v23, 2  ;;  %vm478_vm12 = vc.u32 %v470_v20, %v474_v25  ;;  %v480_v33 = vadd.s32 %v474_v25, %v470_v20  ;;  %vm500_vm13 = vc.u32 %v492_v12, %v496_v19 }
  0x5b   : > { %606 = vst [vmem:[%s1252_s29 + $0x3] sm:$0x1] %v605_v24  ;;  %v479_v35 = vsel %vm478_vm12, 1, %v1098_v6  ;;  %v501_v36 = vsel %vm500_vm13, 1, %v1098_v6  ;;  %v502_v37 = vadd.s32 %v496_v19, %v492_v12  ;;  %v497_v48 = vshrl.u32 %v493_v13, 16 }
  0x5c   : > { %v612_v34 = vadd.f32 %v611_v29, %v610_v23  ;;  %v481_v39 = vadd.s32 %v479_v35, %v473_v18  ;;  %vm482_vm14 = vc.u32 %v480_v33, %v476_v27  ;;  %v503_v40 = vadd.s32 %v501_v36, %v495_v28 }
  0x5d   : > { %v483_v46 = vsel %vm482_vm14, 1, %v1098_v6  ;;  %vm504_vm15 = vc.u32 %v502_v37, %v498_v31  ;;  %v455_v47 = vsel %vm451_vm9, %v1296_v42, %v454_v32  ;;  %v477_v49 = vshrl.u32 %v472_v22, 16 }
  0x5e   : > { %v613_v41 = vrot.slane %v612_v34, 1  ;;  %v485_v51 = vadd.s32 %v483_v46, %v481_v39  ;;  %v505_v50 = vsel %vm504_vm15, 1, %v1098_v6  ;;  %v499_v53 = vshrl.u32 %v494_v14, 16 }
  0x5f   : > { %v507_v54 = vadd.s32 %v505_v50, %v503_v40  ;;  %v506_v56 = vadd.s32 %v502_v37, %v498_v31  ;;  %v456_v57 = vsel %vm450_vm11, %v453_v30, %v455_v47  ;;  %v625_v21 = vsel %vm573_vm2, %v1262_v17, 0.0 }
  0x60   : > { %v614_v52 = vadd.f32 %v613_v41, %v612_v34  ;;  %v486_v55 = vadd.s32 %v485_v51, %v475_v38  ;;  %v510_v61 = vmul.u32 %v1298_v43, %v456_v57  ;;  %v626_v23 = vrot.slane %v625_v21, 4 }
  0x61   : > { %v508_v58 = vadd.s32 %v507_v54, %v497_v48  ;;  %vm419_vm4 = vcmp.lt.s32.totalorder %v1266_v26, 0  ;;  %vm1353_vm5 = vcmp.le.f32.partialorder %v417_v45, 0.7853982  ;;  %vm560_vm9 = vweird.f32 %v1266_v26 }
  0x62   : > { %615 = vst [vmem:[%s1252_s29 + $0x4] sm:$0x1] %v614_v52  ;;  %v487_v59 = vadd.s32 %v486_v55, %v477_v49  ;;  %v627_v24 = vadd.f32 %v626_v23, %v625_v21 }
  0x63   : > { %v509_v60 = vadd.s32 %v508_v58, %v499_v53 }
  0x64   : > { %vm512_vm0 = vc.u32 %v487_v59, %v506_v56  ;;  %v511_v15 = vadd.s32 %v506_v56, %v487_v59  ;;  %v628_v27 = vrot.slane %v627_v24, 2 }
  0x65   : > { %v513_v42 = vadd.s32 1, %v509_v60 }
  0x66   : > { %v629_v31 = vadd.f32 %v628_v27, %v627_v24 }
  0x67   : > { %v514_v62 = vsel %vm512_vm0, %v513_v42, %v509_v60 }
  0x68   : > { %v515_v63 = vadd.s32 %v514_v62, %v510_v61  ;;  %v630_v34 = vrot.slane %v629_v31, 1 }
  0x6a   : > { %v516_v0 = vadd.s32 536870912, %v515_v63  ;;  %v631_v37 = vadd.f32 %v630_v34, %v629_v31 }
  0x6c   : > { %v517_v6 = vshrl.u32 %v516_v0, 30  ;;  %632 = vst [vmem:[%s1252_s29 + $0x6] sm:$0x1] %v631_v37 }
  0x6e   : > { %v518_v44 = vshll.u32 %v517_v6, 30  ;;  %v541_v28 = vsub.s32 4, %v517_v6 }
  0x70   : > { %v519_v1 = vsub.s32 %v515_v63, %v518_v44  ;;  %v542_v35 = vsel %vm419_vm4, %v541_v28, %v517_v6 }
  0x71   : > { %v544_v38 = vsel %vm1353_vm5, 0, %v542_v35 }
  0x72   : > { %vm520_vm1 = vcmp.lt.s32.totalorder %v519_v1, 0  ;;  %v521_v2 = vsub.s32 0, %v519_v1  ;;  %v561_v48 = vand.u32 3, %v544_v38 }
  0x74   : > { %v522_v3 = vsel %vm520_vm1, %v521_v2, %v519_v1  ;;  %vm566_vm6 = vcmp.eq.s32.totalorder %v561_v48, 2  ;;  %vm563_vm7 = vcmp.eq.s32.totalorder %v561_v48, 0  ;;  %vm562_vm8 = vcmp.lt.s32.totalorder %v561_v48, 2 }
  0x75   : > { %v523_v4 = vclz %v522_v3 }
  0x77   : > { %v820_v5 = vadd.s32 4294967294, %v523_v4 }
  0x79   : > { %vm821_vm3 = vcmp.lt.s32.totalorder %v820_v5, 0 }
  0x7a   : > { %v526_v7 = vsel %vm821_vm3, 0, %v820_v5 }
  0x7b   : > { %v527_v8 = vsub.s32 32, %v526_v7  ;;  %v528_v9 = vshll.u32 %v519_v1, %v526_v7  ;;  %v531_v10 = vsub.s32 4294967266, %v526_v7 }
  0x7d   : > { %v529_v43 = vshrl.u32 %v511_v15, %v527_v8  ;;  %v532_v11 = vadd.s32 127, %v531_v10 }
  0x7f   : > { %v530_v12 = vor.u32 %v529_v43, %v528_v9  ;;  %v533_v13 = vshll.u32 %v532_v11, 23 }
  0x81   : > { %v534_v14 = vor.u32 4788187, %v533_v13  ;;  %v537_v16 = vcvt.s32.f32 %v530_v12 }
  0x83   : > { %v535_v20 = vand.u32 2147483647, %v534_v14 }
  0x85   : > { %v538_v22 = vmul.f32 %v537_v16, %v535_v20 }
  0x87   : > { %v539_v19 = vxor.u32 2147483648, %v538_v22 }
  0x89   : > { %v540_v25 = vsel %vm419_vm4, %v539_v19, %v538_v22 }
  0x8a   : > { %v543_v29 = vsel %vm1353_vm5, %v1266_v26, %v540_v25 }
  0x8b   : > { %v545_v30 = vmul.f32 %v543_v29, %v543_v29 }
  0x8d   : > { %v546_v32 = vmul.f32 -0.001358992, %v545_v30  ;;  %v553_v33 = vmul.f32 -0.00019511016, %v545_v30 }
  0x8f   : > { %v547_v45 = vadd.f32 0.041655596, %v546_v32  ;;  %v554_v36 = vadd.f32 0.008332121, %v553_v33 }
  0x91   : > { %v548_v39 = vmul.f32 %v547_v45, %v545_v30  ;;  %v555_v40 = vmul.f32 %v554_v36, %v545_v30 }
  0x93   : > { %v549_v41 = vadd.f32 -0.4999988, %v548_v39  ;;  %v556_v46 = vadd.f32 -0.16666654, %v555_v40 }
  0x95   : > { %v550_v47 = vmul.f32 %v549_v41, %v545_v30  ;;  %v557_v49 = vmul.f32 %v556_v46, %v545_v30 }
  0x97   : > { %v551_v51 = vadd.f32 1.0, %v550_v47  ;;  %v558_v50 = vadd.f32 1.0, %v557_v49 }
  0x99   : > { %v559_v52 = vmul.f32 %v558_v50, %v543_v29  ;;  %v567_v53 = vxor.u32 2147483648, %v551_v51 }
  0x9b   : > { %v564_v54 = vxor.u32 2147483648, %v559_v52  ;;  %v568_v55 = vsel %vm566_vm6, %v567_v53, %v559_v52 }
  0x9d   : > { %v565_v56 = vsel %vm563_vm7, %v551_v51, %v564_v54 }
  0x9e   : > { %v569_v57 = vsel %vm562_vm8, %v565_v56, %v568_v55 }
  0x9f   : > { %v570_v58 = vsel %vm560_vm9, nan, %v569_v57 }
  0xa0   : > { %v571_v59 = vsub.f32 1.0, %v570_v58 }
  0xa2   : > { %v616_v60 = vmul.f32 %v1262_v17, %v571_v59 }
  0xa4   : > { %v617_v61 = vsel %vm573_vm2, %v616_v60, 0.0 }
  0xa5   : > { %v618_v42 = vrot.slane %v617_v61, 4 }
  0xa7   : > { %v619_v62 = vadd.f32 %v618_v42, %v617_v61 }
  0xa9   : > { %v620_v63 = vrot.slane %v619_v62, 2 }
  0xab   : > { %v621_v26 = vadd.f32 %v620_v63, %v619_v62 }
  0xad   : > { %v622_v0 = vrot.slane %v621_v26, 1 }
  0xaf   : > { %v623_v6 = vadd.f32 %v622_v0, %v621_v26 }
  0xb1   : > { %624 = vst [vmem:[%s1252_s29 + $0x5] sm:$0x1] %v623_v6 }
  0xb2   : > { %1034 = shalt.err (!%p1031_p0)
}
  0xb3   : > { %835 = dma.vmem_to_hbm [thread:$0]  (%p1185_p9), %s649_s11, 128, %s651_s12, %s635_s14  }
  0xb4 PF: > { %s1438_s17 = sld [smem:[#allocation14_spill]]  ;;  %s662_s20 = sand.u32 1, %s1073_s15  }
  0xb5   : > { %p848_p1 = pnand %p794_p12, %p1192_p11  ;;  %s663_s23 = scalar_lea.sflag [#allocation4], %s662_s20 }
  0xb7   : > { %p849_p2 = pneg %p848_p1 }
  0xb9   : > { %1068 = dma.done.wait (%p849_p2), %s663_s23, 128  }
  0xba   : > { %1070 = vsyncadd (%p849_p2), %s663_s23, 4294967168  ;;  %s23_s20 = sadd.s32 1, %s1438_s17   ;;  %s1439_s29 = sld [smem:[#allocation12_spill]] }
  0xbb   : > { %p20_p3 = scmp.ge.s32.totalorder %s23_s20, 4   ;;  %s1440_s17 = sld [smem:[#allocation16_spill]] }
  0xbc   : > { %s1441_s18 = sld [smem:[#allocation13_spill]]  ;;  %s1443_s15 = smov %s1077_s16 }
  0xbd   : > { %s1442_s19 = sld [smem:[#allocation15_spill]]  ;;  %22 = sbr.rel (!%p20_p3) target bundleno = 10 (0xa), region = 117 }
  0xc0   : > { %s1444_s16 = smov %s1439_s29 }
  0xc2   :  { %669 = vsyncpa [#allocation3], 1 }
  0xc3   :  { %671 = vsyncpa [#allocation3 + $0x1], 1 }
  0xc4   :  { %672 = vsyncpa [#allocation6], 1 }
  0xc5   :  { %674 = vsyncpa [#allocation6 + $0x1], 1 }
  0xc6   :  { %675 = vsyncpa [#allocation4], 1 }
  0xc7   :  { %677 = vsyncpa [#allocation4 + $0x1], 1 }

</bundles_post_ra>
